<compile_context>
chip_gen: v7x
topology: tpu7x:2x2x1
jax: 0.10.0
libtpu: 0.0.40
codegen_flags: <defaults>
</compile_context>

<pallas_src>
import functools

import jax
import jax.numpy as jnp
from jax.experimental import pallas as pl
from jax.experimental.pallas import tpu as pltpu

LANE = 128     # lane (last-dim) width of a vreg
SUBLANE = 8    # f32 sublane width
SUBLANE_BF16 = 16


def _round_up(x, m):
    return ((x + m - 1) // m) * m


def _cdiv(a, b):
    return -(-a // b)


# ------------------------------ fused kernel -----------------------------------

def _karakasis_fused_kernel(*refs, n_enc, n_dec):
    """Whole Karakasis forward (merged encoder MLP + merged decoder MLP).

    refs = (x,                      # [x_a | x_b], bf16, lane-padded
            [w, b] * n_enc,         # merged (block-diag) encoder, sigmoid-folded
            [w, b] * n_dec,         # merged decoder, sigmoid-folded
            recon,                  # [a_hat | b_hat] output
            z)                      # [z_a | z_b] output
    """
    it = iter(refs)
    x_ref = next(it)
    enc = [(next(it), next(it)) for _ in range(n_enc)]
    dec = [(next(it), next(it)) for _ in range(n_dec)]
    recon_ref = next(it)
    z_ref = next(it)

    def mlp(h, params):
        # Hidden layers: t = tanh(h @ W' + b')   (sigmoid 0.5-scalings folded into W', b')
        # Final layer:   0.5*(tanh(h @ W' + b') + 1) == sigmoid of the un-folded layer.
        n = len(params)
        for l, (w_ref, b_ref) in enumerate(params):
            y = jnp.dot(h.astype(w_ref.dtype), w_ref[...],     # bf16 MXU, f32 accumulate
                        preferred_element_type=jnp.float32)
            t = jnp.tanh(y + b_ref[...])                       # f32 bias add + single EUP op
            h = 0.5 * (t + 1.0) if l == n - 1 else t
        return h

    z = mlp(x_ref[...], enc)                    # [z_a | z_b] (sigmoid space)
    z_ref[...] = z.astype(z_ref.dtype)          # eager store: writeback overlaps decoder
    recon = mlp(z, dec)                         # [a_hat | b_hat]
    recon_ref[...] = recon.astype(recon_ref.dtype)


# ------------------------ parameter init (deterministic) ------------------------

def _init_linear(key, din, dout):
    wk, bk = jax.random.split(key)
    w = jax.random.normal(wk, (din, dout), jnp.float32) / jnp.sqrt(
        jnp.asarray(din, jnp.float32))
    b = 0.01 * jax.random.normal(bk, (dout,), jnp.float32)
    return w, b


def init_mlp(key, dims):
    params = []
    for din, dout in zip(dims[:-1], dims[1:]):
        key, sub = jax.random.split(key)
        params.append(_init_linear(sub, din, dout))
    return params, key


def init_karakasis(key, n_a, n_b, z_dim, layers):
    enc_a_dims = [n_a] + list(layers) + [z_dim]
    enc_b_dims = [n_b] + list(layers) + [z_dim]
    dec_a_dims = [z_dim] + list(layers[::-1]) + [n_a]
    dec_b_dims = [z_dim] + list(layers[::-1]) + [n_b]
    enc_a, key = init_mlp(key, enc_a_dims)
    enc_b, key = init_mlp(key, enc_b_dims)
    dec_a, key = init_mlp(key, dec_a_dims)
    dec_b, key = init_mlp(key, dec_b_dims)
    return {"enc_a": enc_a, "enc_b": enc_b, "dec_a": dec_a, "dec_b": dec_b}


# -------------------- merge + sigmoid-fold + pad (host, one-time) ---------------

def _block_diag(wa, wb):
    ra, ca = wa.shape
    rb, cb = wb.shape
    w = jnp.zeros((ra + rb, ca + cb), wa.dtype)
    return w.at[:ra, :ca].set(wa).at[ra:, ca:].set(wb)


def _merge_encoders(enc_a, enc_b):
    # input [x_a | x_b] -> output [z_a | z_b]; every layer block-diagonal.
    return [(_block_diag(wa, wb), jnp.concatenate([ba, bb]))
            for (wa, ba), (wb, bb) in zip(enc_a, enc_b)]


def _merge_decoders(dec_a, dec_b):
    # input [z_a | z_b]: z_a feeds dec_b (-> b_hat), z_b feeds dec_a (-> a_hat).
    # hidden/output layout: [dec_a chain | dec_b chain]; final = [a_hat | b_hat].
    (wa0, ba0), (wb0, bb0) = dec_a[0], dec_b[0]
    z = wa0.shape[0]
    assert wb0.shape[0] == z
    ca, cb = wa0.shape[1], wb0.shape[1]
    w0 = jnp.zeros((2 * z, ca + cb), wa0.dtype)
    w0 = w0.at[:z, ca:].set(wb0)      # z_a rows -> dec_b block
    w0 = w0.at[z:, :ca].set(wa0)      # z_b rows -> dec_a block
    merged = [(w0, jnp.concatenate([ba0, bb0]))]
    merged += [(_block_diag(wa, wb), jnp.concatenate([ba, bb]))
               for (wa, ba), (wb, bb) in zip(dec_a[1:], dec_b[1:])]
    return merged


def _fold_sigmoid(params):
    """One-time transform so the kernel needs only tanh on hidden layers.

    Kernel computes: t_0 = tanh(x @ W'_0 + b'_0); t_l = tanh(t_{l-1} @ W'_l + b'_l);
    output = 0.5*(t_{L-1}+1)  ==  reference sigmoid-MLP output (exactly, in f32).
    """
    folded = []
    for l, (w, b) in enumerate(params):
        if l == 0:
            folded.append((0.5 * w, 0.5 * b))
        else:
            folded.append((0.25 * w, 0.5 * (b + 0.5 * jnp.sum(w, axis=0))))
    return folded


def _pad_linear(w, b, w_dtype):
    din, dout = w.shape
    dinp, doutp = _round_up(din, LANE), _round_up(dout, LANE)
    w_p = jnp.zeros((dinp, doutp), w_dtype).at[:din, :dout].set(w.astype(w_dtype))
    b_p = jnp.zeros((1, doutp), jnp.float32).at[0, :dout].set(b.astype(jnp.float32))
    return w_p, b_p


def prepare_karakasis_params(raw, n_a, n_b, z_dim, weight_dtype=jnp.bfloat16):
    """Merge encoder/decoder pairs, fold sigmoid scalings, pad to 128 lanes, cast bf16."""
    enc = _fold_sigmoid(_merge_encoders(raw["enc_a"], raw["enc_b"]))
    dec = _fold_sigmoid(_merge_decoders(raw["dec_a"], raw["dec_b"]))
    enc_p = [_pad_linear(w, b, weight_dtype) for (w, b) in enc]
    dec_p = [_pad_linear(w, b, weight_dtype) for (w, b) in dec]
    meta = {
        "n_a": n_a, "n_b": n_b, "z_dim": z_dim,
        "in_pad": _round_up(n_a + n_b, LANE),     # also the recon output width
        "z2_pad": _round_up(2 * z_dim, LANE),
    }
    return {"enc": enc_p, "dec": dec_p, "meta": meta}


# ------------------------------- forward pass ----------------------------------

def karakasis_forward(params, x_a, x_b):
    meta = params["meta"]
    n_a, n_b, z_dim = meta["n_a"], meta["n_b"], meta["z_dim"]
    in_pad, z2_pad = meta["in_pad"], meta["z2_pad"]
    ab_pad = in_pad
    out_dtype = jnp.float32

    batch = x_a.shape[0]
    assert x_b.shape[0] == batch

    # Batch (M) tiling: gridless up to 512 rows; above that split evenly into
    # cdiv(batch, 512) tiles (16-row aligned for bf16 sublane packing) — no
    # more round-up-to-256 padding blowup.
    GRIDLESS_MAX = 512
    bm8 = _round_up(batch, SUBLANE)
    if bm8 <= GRIDLESS_MAX:
        num_tiles, tile_m, bm = 1, bm8, bm8
    else:
        num_tiles = _cdiv(bm8, GRIDLESS_MAX)
        tile_m = _round_up(_cdiv(bm8, num_tiles), SUBLANE_BF16)
        bm = num_tiles * tile_m

    # Merged, lane-padded bf16 input [x_a | x_b].
    x_p = jnp.zeros((bm, in_pad), jnp.bfloat16)
    x_p = x_p.at[:batch, :n_a].set(x_a.astype(jnp.bfloat16))
    x_p = x_p.at[:batch, n_a:n_a + n_b].set(x_b.astype(jnp.bfloat16))

    groups = (params["enc"], params["dec"])
    flat_params = []
    for grp in groups:
        for w, b in grp:
            flat_params += [w, b]

    out_shapes = (
        jax.ShapeDtypeStruct((bm, ab_pad), out_dtype),   # [a_hat | b_hat]
        jax.ShapeDtypeStruct((bm, z2_pad), out_dtype),   # [z_a  | z_b ]
    )

    # Advisory cost estimate for the XLA scheduler.
    flops, transc = 0, 0
    param_bytes = 0
    for grp in groups:
        for w, b in grp:
            kp, np_ = w.shape
            flops += 2 * bm * kp * np_
            transc += bm * np_
            param_bytes += w.size * w.dtype.itemsize + b.size * b.dtype.itemsize
    bytes_acc = (x_p.size * x_p.dtype.itemsize + param_bytes
                 + bm * (ab_pad + z2_pad) * 4)
    cost = pl.CostEstimate(flops=flops, transcendentals=transc,
                           bytes_accessed=bytes_acc)

    # Explicit scoped-VMEM budget (v5e default is only 16 MiB; leave headroom on v7x).
    tile_bytes = tile_m * (in_pad * 2 + (ab_pad + z2_pad) * 4)
    vmem_limit = int(min(max(2 * (param_bytes + tile_bytes) + (8 << 20), 32 << 20),
                         48 << 20))

    kernel = functools.partial(_karakasis_fused_kernel,
                               n_enc=len(params["enc"]),
                               n_dec=len(params["dec"]))

    if num_tiles == 1:
        # Gridless: whole problem VMEM-resident, no pipeline machinery.
        call = pl.pallas_call(
            kernel, out_shape=out_shapes, cost_estimate=cost,
            compiler_params=pltpu.CompilerParams(vmem_limit_bytes=vmem_limit))
    else:
        # Batch-tiled grid: activations/outputs tiled along M ("parallel" for
        # pipelining + megacore sharding); weights whole with a constant
        # index_map so they stay VMEM-resident across M tiles.
        def act_spec(f):
            return pl.BlockSpec((tile_m, f), lambda i: (i, 0))

        def resident_spec(shape):
            # TODO(synk): pipeline_mode=pl.Buffered(1) when layer widths grow
            # (v7x VMEM); irrelevant at 128x128 bf16 layers.
            return pl.BlockSpec(shape, lambda i: (0, 0))

        in_specs = [act_spec(in_pad)]
        for grp in groups:
            for w, b in grp:
                in_specs.append(resident_spec(w.shape))
                in_specs.append(resident_spec(b.shape))
        out_specs = (act_spec(ab_pad), act_spec(z2_pad))

        call = pl.pallas_call(
            kernel, out_shape=out_shapes, grid=(num_tiles,),
            in_specs=in_specs, out_specs=out_specs,
            compiler_params=pltpu.CompilerParams(
                dimension_semantics=("parallel",),
                vmem_limit_bytes=vmem_limit),
            cost_estimate=cost)

    recon_p, z_p = call(x_p, *flat_params)

    a_hat = recon_p[:batch, :n_a]
    b_hat = recon_p[:batch, n_a:n_a + n_b]
    z_a = z_p[:batch, :z_dim]
    z_b = z_p[:batch, z_dim:2 * z_dim]
    return a_hat, b_hat, z_a, z_b


# ---------------------------- pure-JAX reference --------------------------------

def _reference_forward(raw_params, x_a, x_b):
    def mlp(ps, x):
        h = x
        for w, b in ps:
            h = jax.nn.sigmoid(h @ w + b)
        return h
    z_a = mlp(raw_params["enc_a"], x_a)
    z_b = mlp(raw_params["enc_b"], x_b)
    return mlp(raw_params["dec_a"], z_b), mlp(raw_params["dec_b"], z_a), z_a, z_b


# TODO(synk): calc_cca_loss uses torch.linalg.eigh (dense symmetric
# eigendecomposition), which has no clean Pallas TPU equivalent; it is
# loss-only and not part of forward().


if __name__ == "__main__":
    n_a, n_b, z_dim = 16, 12, 4
    layers = [32]

    key = jax.random.PRNGKey(0)
    k_params, k_xa, k_xb = jax.random.split(key, 3)

    raw_params = init_karakasis(k_params, n_a, n_b, z_dim, layers)
    params = prepare_karakasis_params(raw_params, n_a, n_b, z_dim)

    # batch=8   -> gridless path (tiny, whole problem in VMEM)
    # batch=272 -> gridless path (threshold is now 512; no 256-row padding blowup)
    # batch=520 -> batch-tiled "parallel" grid path (2 tiles of 272 rows)
    for batch in (8, 272, 520):
        x_a = jax.random.normal(jax.random.fold_in(k_xa, batch), (batch, n_a), jnp.float32)
        x_b = jax.random.normal(jax.random.fold_in(k_xb, batch), (batch, n_b), jnp.float32)

        outs = karakasis_forward(params, x_a, x_b)
        jax.block_until_ready(outs)
        a_hat, b_hat, z_a, z_b = outs

        assert a_hat.shape == (batch, n_a)
        assert b_hat.shape == (batch, n_b)
        assert z_a.shape == (batch, z_dim)
        assert z_b.shape == (batch, z_dim)

        ref_outs = _reference_forward(raw_params, x_a, x_b)
        for name, got, want in zip(("a_hat", "b_hat", "z_a", "z_b"), outs, ref_outs):
            err = float(jnp.max(jnp.abs(got - want)))
            # bf16 weights / inputs (f32 accumulate): tolerance loosened from 5e-3.
            assert jnp.allclose(got, want, atol=1e-2, rtol=1e-2), (
                f"mismatch in {name} at batch={batch}: max abs err={err}")

    print("KERNEL_OK")
</pallas_src>

<mosaic_0001>
module attributes {stable_mosaic.version = 11 : i64} {
  func.func @_karakasis_fused_kernel(%arg0: memref<8x128xbf16, #tpu.memory_space<vmem>>, %arg1: memref<128x128xbf16, #tpu.memory_space<vmem>>, %arg2: memref<1x128xf32, #tpu.memory_space<vmem>>, %arg3: memref<128x128xbf16, #tpu.memory_space<vmem>>, %arg4: memref<1x128xf32, #tpu.memory_space<vmem>>, %arg5: memref<128x128xbf16, #tpu.memory_space<vmem>>, %arg6: memref<1x128xf32, #tpu.memory_space<vmem>>, %arg7: memref<128x128xbf16, #tpu.memory_space<vmem>>, %arg8: memref<1x128xf32, #tpu.memory_space<vmem>>, %arg9: memref<8x128xf32, #tpu.memory_space<vmem>>, %arg10: memref<8x128xf32, #tpu.memory_space<vmem>>) attributes {dimension_semantics = [], scalar_prefetch = 0 : i64, scratch_operands = 0 : i64, tpu.core_type = #tpu.core_type<tc>} {
    %c0 = arith.constant 0 : index
    %c0_0 = arith.constant 0 : index
    %0 = vector.load %arg0[%c0, %c0_0] : memref<8x128xbf16, #tpu.memory_space<vmem>>, vector<8x128xbf16>
    %c0_1 = arith.constant 0 : index
    %c0_2 = arith.constant 0 : index
    %1 = vector.load %arg1[%c0_1, %c0_2] : memref<128x128xbf16, #tpu.memory_space<vmem>>, vector<128x128xbf16>
    %cst = arith.constant dense<0.000000e+00> : vector<8x128xf32>
    %2 = tpu.matmul %0, %1, %cst {dimension_numbers = #tpu.dot_dimension_numbers<[1], [0], [0], [1], [0, 0, 1, 1], [], []>} : vector<8x128xbf16>, vector<128x128xbf16>, vector<8x128xf32> -> vector<8x128xf32>
    %c0_3 = arith.constant 0 : index
    %c0_4 = arith.constant 0 : index
    %3 = vector.load %arg2[%c0_3, %c0_4] : memref<1x128xf32, #tpu.memory_space<vmem>>, vector<1x128xf32>
    %4 = vector.broadcast %3 : vector<1x128xf32> to vector<8x128xf32>
    %5 = arith.addf %2, %4 : vector<8x128xf32>
    %6 = math.tanh %5 : vector<8x128xf32>
    %7 = arith.truncf %6 : vector<8x128xf32> to vector<8x128xbf16>
    %c0_5 = arith.constant 0 : index
    %c0_6 = arith.constant 0 : index
    %8 = vector.load %arg3[%c0_5, %c0_6] : memref<128x128xbf16, #tpu.memory_space<vmem>>, vector<128x128xbf16>
    %cst_7 = arith.constant dense<0.000000e+00> : vector<8x128xf32>
    %9 = tpu.matmul %7, %8, %cst_7 {dimension_numbers = #tpu.dot_dimension_numbers<[1], [0], [0], [1], [0, 0, 1, 1], [], []>} : vector<8x128xbf16>, vector<128x128xbf16>, vector<8x128xf32> -> vector<8x128xf32>
    %c0_8 = arith.constant 0 : index
    %c0_9 = arith.constant 0 : index
    %10 = vector.load %arg4[%c0_8, %c0_9] : memref<1x128xf32, #tpu.memory_space<vmem>>, vector<1x128xf32>
    %11 = vector.broadcast %10 : vector<1x128xf32> to vector<8x128xf32>
    %12 = arith.addf %9, %11 : vector<8x128xf32>
    %13 = math.tanh %12 : vector<8x128xf32>
    %cst_10 = arith.constant 1.000000e+00 : f32
    %14 = vector.broadcast %cst_10 : f32 to vector<8x128xf32>
    %15 = arith.addf %13, %14 : vector<8x128xf32>
    %cst_11 = arith.constant 5.000000e-01 : f32
    %16 = vector.broadcast %cst_11 : f32 to vector<8x128xf32>
    %17 = arith.mulf %16, %15 : vector<8x128xf32>
    %c0_12 = arith.constant 0 : index
    %c0_13 = arith.constant 0 : index
    %18 = vector.load %arg10[%c0_12, %c0_13] : memref<8x128xf32, #tpu.memory_space<vmem>>, vector<8x128xf32>
    tpu.vector_store %arg10[%c0_12, %c0_13], %17 {strides = array<i32>} : memref<8x128xf32, #tpu.memory_space<vmem>>, vector<8x128xf32>,
    %19 = arith.truncf %17 : vector<8x128xf32> to vector<8x128xbf16>
    %c0_14 = arith.constant 0 : index
    %c0_15 = arith.constant 0 : index
    %20 = vector.load %arg5[%c0_14, %c0_15] : memref<128x128xbf16, #tpu.memory_space<vmem>>, vector<128x128xbf16>
    %cst_16 = arith.constant dense<0.000000e+00> : vector<8x128xf32>
    %21 = tpu.matmul %19, %20, %cst_16 {dimension_numbers = #tpu.dot_dimension_numbers<[1], [0], [0], [1], [0, 0, 1, 1], [], []>} : vector<8x128xbf16>, vector<128x128xbf16>, vector<8x128xf32> -> vector<8x128xf32>
    %c0_17 = arith.constant 0 : index
    %c0_18 = arith.constant 0 : index
    %22 = vector.load %arg6[%c0_17, %c0_18] : memref<1x128xf32, #tpu.memory_space<vmem>>, vector<1x128xf32>
    %23 = vector.broadcast %22 : vector<1x128xf32> to vector<8x128xf32>
    %24 = arith.addf %21, %23 : vector<8x128xf32>
    %25 = math.tanh %24 : vector<8x128xf32>
    %26 = arith.truncf %25 : vector<8x128xf32> to vector<8x128xbf16>
    %c0_19 = arith.constant 0 : index
    %c0_20 = arith.constant 0 : index
    %27 = vector.load %arg7[%c0_19, %c0_20] : memref<128x128xbf16, #tpu.memory_space<vmem>>, vector<128x128xbf16>
    %cst_21 = arith.constant dense<0.000000e+00> : vector<8x128xf32>
    %28 = tpu.matmul %26, %27, %cst_21 {dimension_numbers = #tpu.dot_dimension_numbers<[1], [0], [0], [1], [0, 0, 1, 1], [], []>} : vector<8x128xbf16>, vector<128x128xbf16>, vector<8x128xf32> -> vector<8x128xf32>
    %c0_22 = arith.constant 0 : index
    %c0_23 = arith.constant 0 : index
    %29 = vector.load %arg8[%c0_22, %c0_23] : memref<1x128xf32, #tpu.memory_space<vmem>>, vector<1x128xf32>
    %30 = vector.broadcast %29 : vector<1x128xf32> to vector<8x128xf32>
    %31 = arith.addf %28, %30 : vector<8x128xf32>
    %32 = math.tanh %31 : vector<8x128xf32>
    %cst_24 = arith.constant 1.000000e+00 : f32
    %33 = vector.broadcast %cst_24 : f32 to vector<8x128xf32>
    %34 = arith.addf %32, %33 : vector<8x128xf32>
    %cst_25 = arith.constant 5.000000e-01 : f32
    %35 = vector.broadcast %cst_25 : f32 to vector<8x128xf32>
    %36 = arith.mulf %35, %34 : vector<8x128xf32>
    %c0_26 = arith.constant 0 : index
    %c0_27 = arith.constant 0 : index
    %37 = vector.load %arg9[%c0_26, %c0_27] : memref<8x128xf32, #tpu.memory_space<vmem>>, vector<8x128xf32>
    tpu.vector_store %arg9[%c0_26, %c0_27], %36 {strides = array<i32>} : memref<8x128xf32, #tpu.memory_space<vmem>>, vector<8x128xf32>,
    return
  }
}

</mosaic_0001>

<bundles_post_ra>
// kernel: tpu_custom_call.1
= control target key start
LH: loop header
LB: loop body
LE: loop exit
PB: predicated region body
PF: predicated region fallthrough
CT: control target
= control target key end

     0   :  { %16 = vsyncpa [#allocation3], 0  ;;  %s1173_s0 = inlined_call_operand.hbm [shape: bf16[8,128], index: 0, kind: input, shape index: {}]   ;;  %s1174_s1 = inlined_call_operand.hbm [shape: bf16[128,128], index: 1, kind: input, shape index: {}]   ;;  %s1175_s2 = inlined_call_operand.vmem [shape: f32[1,128], index: 2, kind: input, shape index: {}]   ;;  %s1176_s3 = inlined_call_operand.hbm [shape: bf16[128,128], index: 3, kind: input, shape index: {}]   ;;  %s1177_s4 = inlined_call_operand.vmem [shape: f32[1,128], index: 4, kind: input, shape index: {}]   ;;  %s1178_s5 = inlined_call_operand.hbm [shape: bf16[128,128], index: 5, kind: input, shape index: {}]   ;;  %s1179_s6 = inlined_call_operand.vmem [shape: f32[1,128], index: 6, kind: input, shape index: {}]   ;;  %s1180_s7 = inlined_call_operand.hbm [shape: bf16[128,128], index: 7, kind: input, shape index: {}]   ;;  %s1181_s8 = inlined_call_operand.vmem [shape: f32[1,128], index: 8, kind: input, shape index: {}]   ;;  %s1182_s9 = inlined_call_operand.hbm [shape: f32[8,128], index: 9, kind: output, shape index: {0}]   ;;  %s1183_s10 = inlined_call_operand.hbm [shape: f32[8,128], index: 10, kind: output, shape index: {1}]  }
   0x1   :  { %17 = vsyncpa [#allocation6], 0 }
   0x2   :  { %18 = vsyncpa [#allocation9], 0 }
   0x3   :  { %19 = vsyncpa [#allocation4], 0 }
   0x4   :  { %20 = vsyncpa [#allocation13], 0  ;;  %s959_s13 = smov [#allocation5]   ;;  %s795_s17 = scalar_lea.hbm %s1174_s1, 1024 }
   0x5   :  { %s36_s14 = sshll.u32 %s959_s13, 4  ;;  %p796_p0 = scmp.ne.s32.totalorder %s1174_s1, %s795_s17  ;;  %s37_s14 = int_to_ptr.vmem [resolvable:$true] %s36_s14 }
   0x6   :  { %p799_p1 = scmp.lt.u32.totalorder %s795_s17, %s1174_s1 }
   0x8   :  { %p801_p2 = pnand %p799_p1, %p796_p0 }
   0xa   :  { %804 = shalt.err (!%p801_p2)
}
   0xb   :  { %s805_s22 = scalar_lea.vmem %s37_s14, 1024  ;;  %p810_p4 = scmp.lt.s32.totalorder %s37_s14, %s37_s14 }
   0xc   :  { %p806_p3 = scmp.ne.s32.totalorder %s37_s14, %s805_s22  ;;  %p811_p5 = scmp.lt.s32.totalorder %s805_s22, %s805_s22 }
   0xe   :  { %p812_p6 = por %p811_p5, %p810_p4 }
  0x10   :  { %p813_p7 = pnand %p812_p6, %p806_p3 }
  0x12   :  { %816 = shalt.err (!%p813_p7)
}
  0x13   :  { %s960_s23 = smov 64   ;;  %s961_s24 = smov 4  }
  0x14   :  { %42 = dma.hbm_to_vmem [thread:$0]  %s1174_s1, 1024, %s37_s14, [#allocation6], %s960_s23, %s960_s23, %s961_s24  }
  0x15   :  { %s962_s27 = smov [#allocation8]   ;;  %s963_s29 = smov [#allocation2]  }
  0x16   :  { %s64_s28 = sshll.u32 %s962_s27, 4  ;;  %s27_s30 = sshll.u32 %s963_s29, 4  ;;  %s65_s28 = int_to_ptr.vmem [resolvable:$true] %s64_s28  ;;  %s28_s30 = int_to_ptr.vmem [resolvable:$true] %s27_s30 }
  0x17   :  { %s817_s13 = scalar_lea.hbm %s1178_s5, 1024 }
  0x18   :  { %p818_p8 = scmp.ne.s32.totalorder %s1178_s5, %s817_s13  ;;  %p821_p9 = scmp.lt.u32.totalorder %s817_s13, %s1178_s5 }
  0x1a   :  { %p823_p10 = pnand %p821_p9, %p818_p8 }
  0x1c   :  { %826 = shalt.err (!%p823_p10)
}
  0x1d   :  { %s827_s1 = scalar_lea.vmem %s65_s28, 1024  ;;  %p832_p12 = scmp.lt.s32.totalorder %s65_s28, %s65_s28 }
  0x1e   :  { %p828_p11 = scmp.ne.s32.totalorder %s65_s28, %s827_s1  ;;  %p833_p13 = scmp.lt.s32.totalorder %s827_s1, %s827_s1 }
  0x20   :  { %p834_p0 = por %p833_p13, %p832_p12 }
  0x22   :  { %p835_p1 = pnand %p834_p0, %p828_p11 }
  0x24   :  { %838 = shalt.err (!%p835_p1)
}
  0x25   :  { %70 = dma.hbm_to_vmem [thread:$0]  %s1178_s5, 1024, %s65_s28, [#allocation9], %s960_s23, %s960_s23, %s961_s24  }
  0x26   :  { %s839_s22 = scalar_lea.hbm %s1173_s0, 64 }
  0x27   :  { %p840_p2 = scmp.ne.s32.totalorder %s1173_s0, %s839_s22  ;;  %p843_p3 = scmp.lt.u32.totalorder %s839_s22, %s1173_s0 }
  0x29   :  { %p845_p4 = pnand %p843_p3, %p840_p2 }
  0x2b   :  { %848 = shalt.err (!%p845_p4)
}
  0x2c   :  { %s849_s11 = scalar_lea.vmem %s28_s30, 64  ;;  %p854_p6 = scmp.lt.s32.totalorder %s28_s30, %s28_s30 }
  0x2d   :  { %p850_p5 = scmp.ne.s32.totalorder %s28_s30, %s849_s11  ;;  %p855_p7 = scmp.lt.s32.totalorder %s849_s11, %s849_s11 }
  0x2f   :  { %p856_p8 = por %p855_p7, %p854_p6 }
  0x31   :  { %p857_p9 = pnand %p856_p8, %p850_p5 }
  0x33   :  { %860 = shalt.err (!%p857_p9)
}
  0x34   :  { %30 = dma.hbm_to_vmem [thread:$0]  %s1173_s0, 64, %s28_s30, [#allocation3]  }
  0x35   :  { %s964_s12 = smov [#allocation7]   ;;  %s965_s15 = smov [#allocation10]  }
  0x36   :  { %s50_s13 = sshll.u32 %s964_s12, 4  ;;  %s78_s16 = sshll.u32 %s965_s15, 4  ;;  %s51_s13 = int_to_ptr.vmem [resolvable:$true] %s50_s13  ;;  %s79_s16 = int_to_ptr.vmem [resolvable:$true] %s78_s16 }
  0x37   :  { %s861_s1 = scalar_lea.hbm %s1176_s3, 1024 }
  0x38   :  { %p862_p10 = scmp.ne.s32.totalorder %s1176_s3, %s861_s1  ;;  %p865_p11 = scmp.lt.u32.totalorder %s861_s1, %s1176_s3 }
  0x3a   :  { %p867_p12 = pnand %p865_p11, %p862_p10 }
  0x3c   :  { %870 = shalt.err (!%p867_p12)
}
  0x3d   :  { %s871_s0 = scalar_lea.vmem %s51_s13, 1024  ;;  %p876_p0 = scmp.lt.s32.totalorder %s51_s13, %s51_s13 }
  0x3e   :  { %p872_p13 = scmp.ne.s32.totalorder %s51_s13, %s871_s0  ;;  %p877_p1 = scmp.lt.s32.totalorder %s871_s0, %s871_s0 }
  0x40   :  { %p878_p2 = por %p877_p1, %p876_p0 }
  0x42   :  { %p879_p3 = pnand %p878_p2, %p872_p13 }
  0x44   :  { %882 = shalt.err (!%p879_p3)
}
  0x45   :  { %56 = dma.hbm_to_vmem [thread:$0]  %s1176_s3, 1024, %s51_s13, [#allocation6], %s960_s23, %s960_s23, %s961_s24  }
  0x46   :  { %s883_s27 = scalar_lea.hbm %s1180_s7, 1024 }
  0x47   :  { %p884_p4 = scmp.ne.s32.totalorder %s1180_s7, %s883_s27  ;;  %p887_p5 = scmp.lt.u32.totalorder %s883_s27, %s1180_s7 }
  0x49   :  { %p889_p6 = pnand %p887_p5, %p884_p4 }
  0x4b   :  { %892 = shalt.err (!%p889_p6)
}
  0x4c   :  { %s893_s12 = scalar_lea.vmem %s79_s16, 1024  ;;  %p898_p8 = scmp.lt.s32.totalorder %s79_s16, %s79_s16 }
  0x4d   :  { %p894_p7 = scmp.ne.s32.totalorder %s79_s16, %s893_s12  ;;  %p899_p9 = scmp.lt.s32.totalorder %s893_s12, %s893_s12 }
  0x4f   :  { %p900_p10 = por %p899_p9, %p898_p8 }
  0x51   :  { %p901_p11 = pnand %p900_p10, %p894_p7 }
  0x53   :  { %904 = shalt.err (!%p901_p11)
}
  0x54   :  { %84 = dma.hbm_to_vmem [thread:$0]  %s1180_s7, 1024, %s79_s16, [#allocation9], %s960_s23, %s960_s23, %s961_s24  }
  0x55   :  { %949 = dma.done.wait [#allocation3], 64  }
  0x56   :  { %950 = vsyncadd [#allocation3], 4294967232 }
  0x57   :  { %951 = dma.done.wait [#allocation6], 2048  }
  0x58   :  { %952 = vsyncadd [#allocation6], 4294965248 }
  0x59   :  { %953 = dma.done.wait [#allocation9], 2048  }
  0x5a   :  { %954 = vsyncadd [#allocation9], 4294965248  ;;  %v966_v0 = vmov 0.0   ;;  %vm967_vm0 = vmmov 0   ;;  %v755_v1 = vld [vmem:[#allocation5] sm:$0xff]   ;;  %v756_v2 = vld [vmem:[#allocation5 + $0x8] sm:$0xff]  }
  0x5b   :  { %664 = vmatprep.subr.bf16.mxu0 %v966_v0  ;;  %680 = vmatprep.mubr.msk.bf16.mxu0 %vm967_vm0, %v966_v0  ;;  %v757_v3 = vld [vmem:[#allocation5 + $0x10] sm:$0xff]   ;;  %v763_v4 = vld [vmem:[#allocation7] sm:$0xff]   ;;  %v758_v5 = vld [vmem:[#allocation5 + $0x18] sm:$0xff]   ;;  %s968_s16 = smov [#allocation12]  }
  0x5c   :  { %684 = vmatprep.subr.bf16.mxu1 %v966_v0  ;;  %700 = vmatprep.mubr.msk.bf16.mxu1 %vm967_vm0, %v966_v0  ;;  %v764_v6 = vld [vmem:[#allocation7 + $0x8] sm:$0xff]   ;;  %v759_v7 = vld [vmem:[#allocation5 + $0x20] sm:$0xff]   ;;  %v765_v8 = vld [vmem:[#allocation7 + $0x10] sm:$0xff]   ;;  %s577_s17 = sshll.u32 %s968_s16, 4  ;;  %s578_s17 = int_to_ptr.vmem [resolvable:$true] %s577_s17 }
  0x5d   :  { %665 = vmatpush3.bf16.msra.mxu0 %v755_v1  ;;  %685 = vmatpush3.bf16.msra.mxu1 %v763_v4  ;;  %v760_v9 = vld [vmem:[#allocation5 + $0x28] sm:$0xff]   ;;  %v766_v10 = vld [vmem:[#allocation7 + $0x18] sm:$0xff]   ;;  %v761_v11 = vld [vmem:[#allocation5 + $0x30] sm:$0xff]   ;;  %s905_s18 = scalar_lea.vmem %s578_s17, 128  ;;  %p910_p13 = scmp.lt.s32.totalorder %s578_s17, %s578_s17 }
  0x5e   :  { %666 = vmatprep.subr.bf16.mxu0 %v966_v0  ;;  %686 = vmatprep.subr.bf16.mxu1 %v966_v0  ;;  %v762_v12 = vld [vmem:[#allocation5 + $0x38] sm:$0xff]   ;;  %v767_v14 = vld [vmem:[#allocation7 + $0x20] sm:$0xff]   ;;  %v768_v15 = vld [vmem:[#allocation7 + $0x28] sm:$0xff]   ;;  %p906_p12 = scmp.ne.s32.totalorder %s578_s17, %s905_s18  ;;  %p911_p0 = scmp.lt.s32.totalorder %s905_s18, %s905_s18 }
  0x5f   :  { %v103_v13 = vld [vmem:[#allocation2] sm:$0xf]  ;;  %v769_v16 = vld [vmem:[#allocation7 + $0x30] sm:$0xff]   ;;  %v771_v18 = vld [vmem:[#allocation8] sm:$0xff]  }
  0x60   :  { %v770_v17 = vld [vmem:[#allocation7 + $0x38] sm:$0xff]   ;;  %v772_v19 = vld [vmem:[#allocation8 + $0x8] sm:$0xff]   ;;  %v773_v20 = vld [vmem:[#allocation8 + $0x10] sm:$0xff]   ;;  %p912_p1 = por %p911_p0, %p910_p13 }
  0x61   :  { %667 = vmatpush3.bf16.msra.mxu0 %v756_v2  ;;  %687 = vmatpush3.bf16.msra.mxu1 %v764_v6  ;;  %v592_v21 = vld [vmem:[%s1175_s2] ss:$0 sm:$0xff]  ;;  %v775_v30 = vld [vmem:[#allocation8 + $0x20] sm:$0xff]   ;;  %v776_v31 = vld [vmem:[#allocation8 + $0x28] sm:$0xff]  }
  0x62   :  { %668 = vmatprep.subr.bf16.mxu0 %v966_v0  ;;  %688 = vmatprep.subr.bf16.mxu1 %v966_v0  ;;  %v774_v29 = vld [vmem:[#allocation8 + $0x18] sm:$0xff]   ;;  %v777_v32 = vld [vmem:[#allocation8 + $0x30] sm:$0xff]   ;;  %v779_v34 = vld [vmem:[#allocation10] sm:$0xff]   ;;  %p913_p2 = pnand %p912_p1, %p906_p12 }
  0x63   :  { %v778_v33 = vld [vmem:[#allocation8 + $0x38] sm:$0xff]   ;;  %v780_v35 = vld [vmem:[#allocation10 + $0x8] sm:$0xff]   ;;  %v781_v36 = vld [vmem:[#allocation10 + $0x10] sm:$0xff]  }
  0x64   :  { %v782_v37 = vld [vmem:[#allocation10 + $0x18] sm:$0xff]   ;;  %v783_v48 = vld [vmem:[#allocation10 + $0x20] sm:$0xff]   ;;  %v784_v49 = vld [vmem:[#allocation10 + $0x28] sm:$0xff]  }
  0x65   :  { %669 = vmatpush3.bf16.msra.mxu0 %v757_v3  ;;  %689 = vmatpush3.bf16.msra.mxu1 %v765_v8  ;;  %v601_v38 = vld [vmem:[%s1177_s4] ss:$0 sm:$0xff]  ;;  %v785_v50 = vld [vmem:[#allocation10 + $0x30] sm:$0xff]  }
  0x66   :  { %670 = vmatprep.subr.bf16.mxu0 %v966_v0  ;;  %690 = vmatprep.subr.bf16.mxu1 %v966_v0  ;;  %v786_v51 = vld [vmem:[#allocation10 + $0x38] sm:$0xff]  }
  0x67   :  { %v610_v52 = vld [vmem:[%s1179_s6] ss:$0 sm:$0xff] }
  0x69   :  { %671 = vmatpush3.bf16.msra.mxu0 %v758_v5  ;;  %691 = vmatpush3.bf16.msra.mxu1 %v766_v10 }
  0x6a   :  { %672 = vmatprep.subr.bf16.mxu0 %v966_v0  ;;  %692 = vmatprep.subr.bf16.mxu1 %v966_v0 }
  0x6d   :  { %673 = vmatpush3.bf16.msra.mxu0 %v759_v7  ;;  %693 = vmatpush3.bf16.msra.mxu1 %v767_v14 }
  0x6e   :  { %674 = vmatprep.subr.bf16.mxu0 %v966_v0  ;;  %694 = vmatprep.subr.bf16.mxu1 %v966_v0 }
  0x71   :  { %675 = vmatpush3.bf16.msra.mxu0 %v760_v9  ;;  %695 = vmatpush3.bf16.msra.mxu1 %v768_v15 }
  0x72   :  { %676 = vmatprep.subr.bf16.mxu0 %v966_v0  ;;  %696 = vmatprep.subr.bf16.mxu1 %v966_v0 }
  0x75   :  { %677 = vmatpush3.bf16.msra.mxu0 %v761_v11  ;;  %697 = vmatpush3.bf16.msra.mxu1 %v769_v16 }
  0x76   :  { %678 = vmatprep.subr.bf16.mxu0 %v966_v0  ;;  %698 = vmatprep.subr.bf16.mxu1 %v966_v0 }
  0x79   :  { %679 = vmatpush3.bf16.msra.mxu0 %v762_v12  ;;  %699 = vmatpush3.bf16.msra.mxu1 %v770_v17 }
  0x7a   :  { %704 = vmatprep.subr.bf16.mxu0 %v966_v0  ;;  %724 = vmatprep.subr.bf16.mxu1 %v966_v0 }
  0x7c   :  { %681 = vmatmul.mubr.bf16.vlgmr.msra.gmra.mrb[0].mxu0 %v103_v13 }
  0x7d   :  { %720 = vmatprep.mubr.msk.bf16.mxu0 %vm967_vm0, %v966_v0  ;;  %705 = vmatpush3.bf16.msra.mxu0 %v771_v18 }
  0x7e   :  { %706 = vmatprep.subr.bf16.mxu0 %v966_v0 }
  0x81   :  { %707 = vmatpush3.bf16.msra.mxu0 %v772_v19 }
  0x82   :  { %708 = vmatprep.subr.bf16.mxu0 %v966_v0 }
  0x85   :  { %709 = vmatpush3.bf16.msra.mxu0 %v773_v20 }
  0x86   :  { %710 = vmatprep.subr.bf16.mxu0 %v966_v0 }
  0x89   :  { %711 = vmatpush3.bf16.msra.mxu0 %v774_v29 }
  0x8a   :  { %712 = vmatprep.subr.bf16.mxu0 %v966_v0 }
  0x8d   :  { %713 = vmatpush3.bf16.msra.mxu0 %v775_v30 }
  0x8e   :  { %714 = vmatprep.subr.bf16.mxu0 %v966_v0 }
  0x91   :  { %715 = vmatpush3.bf16.msra.mxu0 %v776_v31 }
  0x92   :  { %716 = vmatprep.subr.bf16.mxu0 %v966_v0 }
  0x95   :  { %717 = vmatpush3.bf16.msra.mxu0 %v777_v32 }
  0x96   :  { %718 = vmatprep.subr.bf16.mxu0 %v966_v0 }
  0x99   :  { %719 = vmatpush3.bf16.msra.mxu0 %v778_v33 }
 0x14f   :  { %v209_v22 = vpop.f32.mrb[0].mxu0 }
 0x150   :  { %v210_v23 = vadd.f32 %v592_v21, %v209_v22  ;;  %v682_v24 = vpop.f32.mrb[1].mxu0 }
 0x151   :  { %v212_v25 = vpop.f32.mrb[2].mxu0 }
 0x152   :  { %787 = vtanh.f32 %v210_v23  ;;  %v683_v26 = vpop.f32.mrb[3].mxu0 }
 0x15c   :  { %v788_v27 = vpop.eup %787 }
 0x15d   :  { %v216_v28 = vpack.c.bf16 %v788_v27, %v788_v27 }
 0x15f   :  { %701 = vmatmul.mubr.bf16.vlgmr.msra.gmra.mrb[0].mxu1 %v216_v28 }
 0x160   :  { %740 = vmatprep.mubr.msk.bf16.mxu1 %vm967_vm0, %v966_v0  ;;  %725 = vmatpush3.bf16.msra.mxu1 %v779_v34 }
 0x161   :  { %726 = vmatprep.subr.bf16.mxu1 %v966_v0 }
 0x164   :  { %727 = vmatpush3.bf16.msra.mxu1 %v780_v35 }
 0x165   :  { %728 = vmatprep.subr.bf16.mxu1 %v966_v0 }
 0x168   :  { %729 = vmatpush3.bf16.msra.mxu1 %v781_v36 }
 0x169   :  { %730 = vmatprep.subr.bf16.mxu1 %v966_v0 }
 0x16c   :  { %731 = vmatpush3.bf16.msra.mxu1 %v782_v37 }
 0x16d   :  { %732 = vmatprep.subr.bf16.mxu1 %v966_v0 }
 0x170   :  { %733 = vmatpush3.bf16.msra.mxu1 %v783_v48 }
 0x171   :  { %734 = vmatprep.subr.bf16.mxu1 %v966_v0 }
 0x174   :  { %735 = vmatpush3.bf16.msra.mxu1 %v784_v49 }
 0x175   :  { %736 = vmatprep.subr.bf16.mxu1 %v966_v0 }
 0x178   :  { %737 = vmatpush3.bf16.msra.mxu1 %v785_v50 }
 0x179   :  { %738 = vmatprep.subr.bf16.mxu1 %v966_v0 }
 0x17c   :  { %739 = vmatpush3.bf16.msra.mxu1 %v786_v51 }
 0x232   :  { %v322_v39 = vpop.f32.mrb[0].mxu1 }
 0x233   :  { %v323_v40 = vadd.f32 %v601_v38, %v322_v39  ;;  %v702_v41 = vpop.f32.mrb[1].mxu1 }
 0x234   :  { %v325_v42 = vpop.f32.mrb[2].mxu1 }
 0x235   :  { %789 = vtanh.f32 %v323_v40  ;;  %v703_v43 = vpop.f32.mrb[3].mxu1 }
 0x23f   :  { %v790_v44 = vpop.eup %789 }
 0x240   :  { %v329_v45 = vadd.f32 1.0, %v790_v44 }
 0x242   :  { %v330_v46 = vmul.f32 0.5, %v329_v45 }
 0x244   :  { %v332_v47 = vpack.c.bf16 %v330_v46, %v330_v46  ;;  %331 = vst [vmem:[#allocation12] sm:$0xff] %v330_v46 }
 0x246   :  { %721 = vmatmul.mubr.bf16.vlgmr.msra.gmra.mrb[4].mxu0 %v332_v47 }
 0x319   :  { %v438_v53 = vpop.f32.mrb[4].mxu0 }
 0x31a   :  { %v439_v54 = vadd.f32 %v610_v52, %v438_v53  ;;  %v722_v55 = vpop.f32.mrb[5].mxu0 }
 0x31b   :  { %v441_v56 = vpop.f32.mrb[6].mxu0 }
 0x31c   :  { %791 = vtanh.f32 %v439_v54  ;;  %v723_v57 = vpop.f32.mrb[7].mxu0 }
 0x326   :  { %v792_v58 = vpop.eup %791 }
 0x327   :  { %v445_v59 = vpack.c.bf16 %v792_v58, %v792_v58 }
 0x329   :  { %741 = vmatmul.mubr.bf16.vlgmr.msra.gmra.mrb[4].mxu1 %v445_v59 }
 0x32a   :  { %916 = shalt.err (!%p913_p2)
}
 0x32b   :  { %s917_s14 = scalar_lea.hbm %s1183_s10, 128 }
 0x32c   :  { %p918_p3 = scmp.ne.s32.totalorder %s1183_s10, %s917_s14  ;;  %p921_p4 = scmp.lt.u32.totalorder %s917_s14, %s1183_s10 }
 0x32e   :  { %p923_p5 = pnand %p921_p4, %p918_p3 }
 0x330   :  { %926 = shalt.err (!%p923_p5)
}
 0x331   :  { %580 = dma.vmem_to_hbm [thread:$0]  %s578_s17, 128, %s1183_s10, [#allocation13]   ;;  %v619_v60 = vld [vmem:[%s1181_s8] ss:$0 sm:$0xff] }
 0x332   :  { %s969_s27 = smov [#allocation11]  }
 0x333   :  { %s567_s29 = sshll.u32 %s969_s27, 4  ;;  %s568_s29 = int_to_ptr.vmem [resolvable:$true] %s567_s29 }
 0x334   :  { %s927_s11 = scalar_lea.vmem %s568_s29, 128  ;;  %p932_p7 = scmp.lt.s32.totalorder %s568_s29, %s568_s29 }
 0x335   :  { %p928_p6 = scmp.ne.s32.totalorder %s568_s29, %s927_s11  ;;  %p933_p8 = scmp.lt.s32.totalorder %s927_s11, %s927_s11 }
 0x337   :  { %p934_p9 = por %p933_p8, %p932_p7 }
 0x339   :  { %p935_p10 = pnand %p934_p9, %p928_p6 }
 0x3fc   :  { %v551_v61 = vpop.f32.mrb[4].mxu1 }
 0x3fd   :  { %v552_v62 = vadd.f32 %v619_v60, %v551_v61  ;;  %v742_v63 = vpop.f32.mrb[5].mxu1 }
 0x3fe   :  { %v554_v0 = vpop.f32.mrb[6].mxu1 }
 0x3ff   :  { %793 = vtanh.f32 %v552_v62  ;;  %v743_v1 = vpop.f32.mrb[7].mxu1 }
 0x409   :  { %v794_v2 = vpop.eup %793 }
 0x40a   :  { %v558_v3 = vadd.f32 1.0, %v794_v2 }
 0x40c   :  { %v559_v4 = vmul.f32 0.5, %v558_v3 }
 0x40e   :  { %560 = vst [vmem:[#allocation11] sm:$0xff] %v559_v4 }
 0x40f   :  { %938 = shalt.err (!%p935_p10)
}
 0x410   :  { %s939_s5 = scalar_lea.hbm %s1182_s9, 128 }
 0x411   :  { %p940_p11 = scmp.ne.s32.totalorder %s1182_s9, %s939_s5  ;;  %p943_p12 = scmp.lt.u32.totalorder %s939_s5, %s1182_s9 }
 0x413   :  { %p945_p13 = pnand %p943_p12, %p940_p11 }
 0x415   :  { %948 = shalt.err (!%p945_p13)
}
 0x416   :  { %570 = dma.vmem_to_hbm [thread:$0]  %s568_s29, 128, %s1182_s9, [#allocation4]  }
 0x417   :  { %955 = dma.done.wait [#allocation4], 128  }
 0x418   :  { %956 = vsyncadd [#allocation4], 4294967168 }
 0x419   :  { %957 = dma.done.wait [#allocation13], 128  }
 0x41a   :  { %958 = vsyncadd [#allocation13], 4294967168 }
 0x41b   :  { %587 = vsyncpa [#allocation3], 1 }
 0x41c   :  { %588 = vsyncpa [#allocation6], 1 }
 0x41d   :  { %589 = vsyncpa [#allocation9], 1 }
 0x41e   :  { %590 = vsyncpa [#allocation4], 1 }
 0x41f   :  { %591 = vsyncpa [#allocation13], 1 }

</bundles_post_ra>
